<compile_context>
chip_gen: v7x
topology: tpu7x:2x2x1
jax: 0.10.0
libtpu: 0.0.40
codegen_flags: <defaults>
</compile_context>

<pallas_src>
import jax
import jax.numpy as jnp
from jax import lax
from jax.experimental import pallas as pl
from jax.experimental.pallas import tpu as pltpu


def _cdiv(a, b):
    return -(-a // b)


def _round_up(a, b):
    return _cdiv(a, b) * b


def _make_rnn_kernel(Ts, rem, n_sc, H, Gp):
    """Factory closing over the static chunk sizes / gate width."""

    def kernel(emb_ref, w_ih_ref, w_hh_ref, b_ref, w_fc_ref, b_fc_ref,
               out_ref, h_scr, c_scr, xp_scr):
        _, TB, E = emb_ref.shape
        s = pl.program_id(1)                       # time-chunk index (innermost)

        @pl.when(s == 0)
        def _init():
            h_scr[...] = jnp.zeros_like(h_scr)
            c_scr[...] = jnp.zeros_like(c_scr)

        # Hoisted input projection for this time chunk: ONE bf16 MXU matmul
        # with f32 accumulation, bias folded in.
        x = emb_ref[...].reshape(Ts * TB, E)                       # bf16
        xp_scr[...] = (jnp.dot(x, w_ih_ref[...],
                               preferred_element_type=jnp.float32)
                       + b_ref[...])                               # (Ts*TB, Gp) f32

        w_hh = w_hh_ref[...]                                       # (H, Gp) bf16

        def step(t, carry):
            h, c = carry                                           # h bf16, c f32
            row = pl.multiple_of(t * TB, TB)
            gates = xp_scr[pl.ds(row, TB), :] + jnp.dot(
                h, w_hh, preferred_element_type=jnp.float32)       # (TB, Gp) f32
            # Gate order along lanes: [i, f, o, g] (reordered in the wrapper).
            sig = jax.nn.sigmoid(gates[:, 0:3 * H])                # i,f,o in one EUP group
            g = jnp.tanh(gates[:, 3 * H:4 * H])
            i = sig[:, 0:H]
            f = sig[:, H:2 * H]
            o = sig[:, 2 * H:3 * H]
            c_new = f * c + i * g
            h_new = (o * jnp.tanh(c_new)).astype(h_scr.dtype)      # carry h in bf16
            return h_new, c_new

        def run(n_steps):
            return lax.fori_loop(0, n_steps, step,
                                 (h_scr[...], c_scr[...]),
                                 unroll=min(8, n_steps))

        def finalize(h_last):
            # TODO(synk): nn.Dropout(0.2) is identity in eval mode; training-mode
            # stochastic masking of h_last is not implemented here.
            # Final FC (H -> 1) on VPU multiply + lane reduction: avoids a
            # 1-column MXU matmul.
            logits = jnp.sum(h_last.astype(jnp.float32) * w_fc_ref[...],
                             axis=-1, keepdims=True)               # (TB, 1)
            out_ref[...] = jax.nn.sigmoid(logits + b_fc_ref[...])

        if rem == Ts:
            # Every chunk (including the last) runs exactly Ts valid steps.
            h_last, c_last = run(Ts)
            h_scr[...] = h_last
            c_scr[...] = c_last

            @pl.when(s == n_sc - 1)
            def _fin():
                finalize(h_last)
        else:
            # Ragged last chunk: static rem-step loop, no per-step masking.
            @pl.when(s < n_sc - 1)
            def _full():
                h_last, c_last = run(Ts)
                h_scr[...] = h_last
                c_scr[...] = c_last

            @pl.when(s == n_sc - 1)
            def _last():
                h_last, c_last = run(rem)
                h_scr[...] = h_last
                c_scr[...] = c_last
                finalize(h_last)

    return kernel


def rnn_forward(input_x, embeddings, w_ih, w_hh, b_ih, b_hh, w_fc, b_fc,
                *, time_chunk=16, min_batch_tiles=None):
    """input_x: (B, S) int32 token ids.  Returns (B, 1) float32 in [0, 1]."""
    B, S = input_x.shape
    E = embeddings.shape[1]
    H = w_hh.shape[1]
    Gp = _round_up(4 * H, 128)                    # packed gate lanes (no per-gate pad)

    # ---- chip hint: v7x has 2 TensorCores and only 64 MiB VMEM per TC ------
    try:
        kind = jax.devices()[0].device_kind.lower()
    except Exception:
        kind = ""
    is_v7 = "v7" in kind

    # ---- batch tiling -------------------------------------------------------
    B_pad0 = _round_up(B, 8)
    n_bt = _cdiv(B_pad0, 128) if B_pad0 > 128 else 1
    if min_batch_tiles is None:
        # Give both v7x TensorCores work when the batch permits without
        # adding dead rows beyond sublane padding.
        min_batch_tiles = 2 if (is_v7 and B_pad0 >= 16) else 1
    n_bt = max(n_bt, min_batch_tiles)
    TB = _round_up(_cdiv(B_pad0, n_bt), 8)
    B_pad = n_bt * TB

    # ---- time chunking (fixed Ts + ragged last chunk) -----------------------
    Ts = max(1, min(time_chunk, S))

    # VMEM budget: keep the hoisted-projection scratch + double-buffered
    # blocks inside the scoped limit (56 MiB on v7x, 100 MiB elsewhere).
    def _est_vmem_bytes(ts):
        xp = ts * TB * Gp * 4                       # f32 projection scratch
        embb = 2 * ts * TB * E * 2                  # bf16 emb blocks, double-buffered
        wgt = 2 * (E + H) * Gp * 2                  # bf16 weights, double-buffered
        hc = TB * H * 6                             # h (bf16) + c (f32) carries
        rest = 2 * (Gp * 4 + 128 * 4 + 512) + TB * 8
        return xp + embb + wgt + hc + rest

    budget = (56 if is_v7 else 100) << 20
    while Ts > 1 and _est_vmem_bytes(Ts) > budget - (4 << 20):
        Ts = max(1, Ts // 2)

    n_sc = _cdiv(S, Ts)
    rem = S - (n_sc - 1) * Ts                     # 1 <= rem <= Ts (static)
    S_pad = n_sc * Ts

    # ---- glue: embedding gather directly in bf16 (permute(1,0) + lookup) ----
    emb = jnp.take(embeddings.astype(jnp.bfloat16), input_x.T, axis=0)  # (S,B,E) bf16
    emb = jnp.pad(emb, ((0, S_pad - S), (0, B_pad - B), (0, 0)))

    # ---- gate-weight packing: reorder [i,f,g,o] -> [i,f,o,g], pad 4H -> Gp --
    def pack_gates(w_t):                          # (in_dim, 4H) -> (in_dim, Gp)
        in_dim = w_t.shape[0]
        w4 = w_t.reshape(in_dim, 4, H)[:, [0, 1, 3, 2], :]   # [i,f,o,g]
        w2 = w4.reshape(in_dim, 4 * H)
        return jnp.pad(w2, ((0, 0), (0, Gp - 4 * H)))

    w_ih_p = pack_gates(w_ih.T).astype(jnp.bfloat16)                  # (E, Gp)
    w_hh_p = pack_gates(w_hh.T).astype(jnp.bfloat16)                  # (H, Gp)
    bias_p = pack_gates((b_ih + b_hh).reshape(1, 4 * H)).astype(jnp.float32)  # (1, Gp)
    w_fc_row = w_fc.reshape(1, H).astype(jnp.float32)                 # (1, H)
    b_fc_p = b_fc.reshape(1, 1).astype(jnp.float32)                   # (1, 1)

    kernel = _make_rnn_kernel(Ts, rem, n_sc, H, Gp)

    out = pl.pallas_call(
        kernel,
        out_shape=jax.ShapeDtypeStruct((B_pad, 1), jnp.float32),
        grid_spec=pltpu.PrefetchScalarGridSpec(
            num_scalar_prefetch=0,
            grid=(n_bt, n_sc),
            in_specs=[
                # embedded sequence: streamed per (batch tile, time chunk)
                pl.BlockSpec((Ts, TB, E), lambda b, s: (s, b, 0)),
                # weights / biases: constant block -> fetched once, resident
                pl.BlockSpec((E, Gp), lambda b, s: (0, 0)),
                pl.BlockSpec((H, Gp), lambda b, s: (0, 0)),
                pl.BlockSpec((1, Gp), lambda b, s: (0, 0)),
                pl.BlockSpec((1, H), lambda b, s: (0, 0)),
                pl.BlockSpec((1, 1), lambda b, s: (0, 0)),
            ],
            out_specs=pl.BlockSpec((TB, 1), lambda b, s: (b, 0)),
            scratch_shapes=[
                pltpu.VMEM((TB, H), jnp.bfloat16),           # h carry (bf16)
                pltpu.VMEM((TB, H), jnp.float32),            # c carry (f32)
                pltpu.VMEM((Ts * TB, Gp), jnp.float32),      # hoisted X_proj
            ],
        ),
        # batch tiles independent (2 TCs on v7x); time chunks sequential.
        compiler_params=pltpu.CompilerParams(
            dimension_semantics=("parallel", "arbitrary"),
            vmem_limit_bytes=int(budget)),
    )(emb, w_ih_p, w_hh_p, bias_p, w_fc_row, b_fc_p)

    return out[:B]


def rnn_reference(input_x, embeddings, w_ih, w_hh, b_ih, b_hh, w_fc, b_fc):
    """Pure-JAX f32 reference mirroring the PyTorch module (eval mode)."""
    emb = jnp.take(embeddings, input_x.T, axis=0).astype(jnp.float32)  # (S,B,E)
    B = input_x.shape[0]
    H = w_hh.shape[1]
    h = jnp.zeros((B, H), jnp.float32)
    c = jnp.zeros((B, H), jnp.float32)
    for t in range(emb.shape[0]):
        gates = emb[t] @ w_ih.T + h @ w_hh.T + b_ih + b_hh
        i = jax.nn.sigmoid(gates[:, 0 * H:1 * H])
        f = jax.nn.sigmoid(gates[:, 1 * H:2 * H])
        g = jnp.tanh(gates[:, 2 * H:3 * H])
        o = jax.nn.sigmoid(gates[:, 3 * H:4 * H])
        c = f * c + i * g
        h = o * jnp.tanh(c)
    return jax.nn.sigmoid(h @ w_fc.T + b_fc)


if __name__ == "__main__":
    # Small, deterministic configuration consistent with the module:
    VOCAB, EMB_DIM = 50, 32          # embeddings.shape
    LSTM_DIM = 32                    # hidden size
    N_LAYERS, BIDIRECTIONAL = 1, False
    B, S = 4, 8                      # batch, sequence length

    key = jax.random.PRNGKey(0)
    k_emb, k_wih, k_whh, k_bih, k_bhh, k_wfc, k_bfc, k_x = jax.random.split(key, 8)

    embeddings = jax.random.normal(k_emb, (VOCAB, EMB_DIM), jnp.float32) * 0.1
    w_ih = jax.random.normal(k_wih, (4 * LSTM_DIM, EMB_DIM), jnp.float32) * 0.1
    w_hh = jax.random.normal(k_whh, (4 * LSTM_DIM, LSTM_DIM), jnp.float32) * 0.1
    b_ih = jax.random.normal(k_bih, (4 * LSTM_DIM,), jnp.float32) * 0.1
    b_hh = jax.random.normal(k_bhh, (4 * LSTM_DIM,), jnp.float32) * 0.1
    w_fc = jax.random.normal(k_wfc, (1, LSTM_DIM), jnp.float32) * 0.1
    b_fc = jax.random.normal(k_bfc, (1,), jnp.float32) * 0.1

    input_x = jax.random.randint(k_x, (B, S), 0, VOCAB, jnp.int32)

    out = rnn_forward(input_x, embeddings, w_ih, w_hh, b_ih, b_hh, w_fc, b_fc)
    out = jax.block_until_ready(out)
    assert out.shape == (B, 1) and out.dtype == jnp.float32

    ref = rnn_reference(input_x, embeddings, w_ih, w_hh, b_ih, b_hh, w_fc, b_fc)
    assert jnp.allclose(out, ref, atol=2e-2), (out, ref)

    print("KERNEL_OK")
</pallas_src>

<mosaic_0001>
module attributes {stable_mosaic.version = 11 : i64} {
  func.func @kernel(%arg0: i32, %arg1: i32, %arg2: memref<8x8x32xbf16, #tpu.memory_space<vmem>>, %arg3: memref<32x128xbf16, #tpu.memory_space<vmem>>, %arg4: memref<32x128xbf16, #tpu.memory_space<vmem>>, %arg5: memref<1x128xf32, #tpu.memory_space<vmem>>, %arg6: memref<1x32xf32, #tpu.memory_space<vmem>>, %arg7: memref<1x1xf32, #tpu.memory_space<vmem>>, %arg8: memref<8x1xf32, #tpu.memory_space<vmem>>, %arg9: memref<8x32xbf16, #tpu.memory_space<vmem>>, %arg10: memref<8x32xf32, #tpu.memory_space<vmem>>, %arg11: memref<64x128xf32, #tpu.memory_space<vmem>>) attributes {dimension_semantics = [#tpu.dimension_semantics<parallel>, #tpu.dimension_semantics<arbitrary>], iteration_bounds = array<i64: 1, 1>, scalar_prefetch = 0 : i64, scratch_operands = 3 : i64, tpu.core_type = #tpu.core_type<tc>, window_params = [{transform_indices = @transform_0, window_bounds = array<i64: 8, 8, 32>}, {pipeline_mode = #tpu.pipeline_mode<synchronous>, transform_indices = @transform_1, window_bounds = array<i64: 32, 128>}, {pipeline_mode = #tpu.pipeline_mode<synchronous>, transform_indices = @transform_2, window_bounds = array<i64: 32, 128>}, {pipeline_mode = #tpu.pipeline_mode<synchronous>, transform_indices = @transform_3, window_bounds = array<i64: 1, 128>}, {pipeline_mode = #tpu.pipeline_mode<synchronous>, transform_indices = @transform_4, window_bounds = array<i64: 1, 32>}, {pipeline_mode = #tpu.pipeline_mode<synchronous>, transform_indices = @transform_5, window_bounds = array<i64: 1, 1>}, {transform_indices = @transform_6, window_bounds = array<i64: 8, 1>}]} {
    %c0_i32 = arith.constant 0 : i32
    %0 = arith.cmpi eq, %arg1, %c0_i32 : i32
    %1 = arith.extui %0 : i1 to i32
    %c0_i32_0 = arith.constant 0 : i32
    %2 = arith.cmpi ne, %1, %c0_i32_0 : i32
    scf.if %2 {
      %cst_54 = arith.constant 0.000000e+00 : bf16
      %203 = vector.broadcast %cst_54 : bf16 to vector<8x32xbf16>
      %c0_55 = arith.constant 0 : index
      %c0_56 = arith.constant 0 : index
      %204 = vector.load %arg9[%c0_55, %c0_56] : memref<8x32xbf16, #tpu.memory_space<vmem>>, vector<8x32xbf16>
      tpu.vector_store %arg9[%c0_55, %c0_56], %203 {strides = array<i32>} : memref<8x32xbf16, #tpu.memory_space<vmem>>, vector<8x32xbf16>,
      %cst_57 = arith.constant 0.000000e+00 : f32
      %205 = vector.broadcast %cst_57 : f32 to vector<8x32xf32>
      %c0_58 = arith.constant 0 : index
      %c0_59 = arith.constant 0 : index
      %206 = vector.load %arg10[%c0_58, %c0_59] : memref<8x32xf32, #tpu.memory_space<vmem>>, vector<8x32xf32>
      tpu.vector_store %arg10[%c0_58, %c0_59], %205 {strides = array<i32>} : memref<8x32xf32, #tpu.memory_space<vmem>>, vector<8x32xf32>,
    } else {
    }
    %c0 = arith.constant 0 : index
    %c0_1 = arith.constant 0 : index
    %c0_2 = arith.constant 0 : index
    %3 = vector.load %arg2[%c0, %c0_1, %c0_2] : memref<8x8x32xbf16, #tpu.memory_space<vmem>>, vector<8x8x32xbf16>
    %4 = vector.shape_cast %3 : vector<8x8x32xbf16> to vector<64x32xbf16>
    %c0_3 = arith.constant 0 : index
    %c0_4 = arith.constant 0 : index
    %5 = vector.load %arg3[%c0_3, %c0_4] : memref<32x128xbf16, #tpu.memory_space<vmem>>, vector<32x128xbf16>
    %cst = arith.constant dense<0.000000e+00> : vector<64x128xf32>
    %6 = tpu.matmul %4, %5, %cst {dimension_numbers = #tpu.dot_dimension_numbers<[1], [0], [0], [1], [0, 0, 1, 1], [], []>} : vector<64x32xbf16>, vector<32x128xbf16>, vector<64x128xf32> -> vector<64x128xf32>
    %c0_5 = arith.constant 0 : index
    %c0_6 = arith.constant 0 : index
    %7 = vector.load %arg5[%c0_5, %c0_6] : memref<1x128xf32, #tpu.memory_space<vmem>>, vector<1x128xf32>
    %8 = vector.broadcast %7 : vector<1x128xf32> to vector<64x128xf32>
    %9 = arith.addf %6, %8 : vector<64x128xf32>
    %c0_7 = arith.constant 0 : index
    %c0_8 = arith.constant 0 : index
    %10 = vector.load %arg11[%c0_7, %c0_8] : memref<64x128xf32, #tpu.memory_space<vmem>>, vector<64x128xf32>
    tpu.vector_store %arg11[%c0_7, %c0_8], %9 {strides = array<i32>} : memref<64x128xf32, #tpu.memory_space<vmem>>, vector<64x128xf32>,
    %c0_9 = arith.constant 0 : index
    %c0_10 = arith.constant 0 : index
    %11 = vector.load %arg4[%c0_9, %c0_10] : memref<32x128xbf16, #tpu.memory_space<vmem>>, vector<32x128xbf16>
    %c0_11 = arith.constant 0 : index
    %c0_12 = arith.constant 0 : index
    %12 = vector.load %arg9[%c0_11, %c0_12] : memref<8x32xbf16, #tpu.memory_space<vmem>>, vector<8x32xbf16>
    %c0_13 = arith.constant 0 : index
    %c0_14 = arith.constant 0 : index
    %13 = vector.load %arg10[%c0_13, %c0_14] : memref<8x32xf32, #tpu.memory_space<vmem>>, vector<8x32xf32>
    %c0_i32_15 = arith.constant 0 : i32
    %c8_i32 = arith.constant 8 : i32
    %14 = arith.muli %c0_i32_15, %c8_i32 : i32
    %15 = tpu.assume_multiple %14, 8 : i32
    %16 = arith.index_cast %15 : i32 to index
    %c0_16 = arith.constant 0 : index
    %17 = vector.load %arg11[%16, %c0_16] : memref<64x128xf32, #tpu.memory_space<vmem>>, vector<8x128xf32>
    %cst_17 = arith.constant dense<0.000000e+00> : vector<8x128xf32>
    %18 = tpu.matmul %12, %11, %cst_17 {dimension_numbers = #tpu.dot_dimension_numbers<[1], [0], [0], [1], [0, 0, 1, 1], [], []>} : vector<8x32xbf16>, vector<32x128xbf16>, vector<8x128xf32> -> vector<8x128xf32>
    %19 = arith.addf %17, %18 : vector<8x128xf32>
    %20 = vector.extract_strided_slice %19 {offsets = [0, 0], sizes = [8, 96], strides = [1, 1]} : vector<8x128xf32> to vector<8x96xf32>
    %21 = arith.negf %20 : vector<8x96xf32>
    %22 = math.exp %21 : vector<8x96xf32>
    %cst_18 = arith.constant 1.000000e+00 : f32
    %23 = vector.broadcast %cst_18 : f32 to vector<8x96xf32>
    %24 = arith.addf %23, %22 : vector<8x96xf32>
    %25 = arith.divf %23, %24 : vector<8x96xf32>
    %26 = vector.extract_strided_slice %19 {offsets = [0, 96], sizes = [8, 32], strides = [1, 1]} : vector<8x128xf32> to vector<8x32xf32>
    %27 = math.tanh %26 : vector<8x32xf32>
    %28 = vector.extract_strided_slice %25 {offsets = [0, 0], sizes = [8, 32], strides = [1, 1]} : vector<8x96xf32> to vector<8x32xf32>
    %29 = vector.extract_strided_slice %25 {offsets = [0, 32], sizes = [8, 32], strides = [1, 1]} : vector<8x96xf32> to vector<8x32xf32>
    %30 = vector.extract_strided_slice %25 {offsets = [0, 64], sizes = [8, 32], strides = [1, 1]} : vector<8x96xf32> to vector<8x32xf32>
    %31 = arith.mulf %29, %13 : vector<8x32xf32>
    %32 = arith.mulf %28, %27 : vector<8x32xf32>
    %33 = arith.addf %31, %32 : vector<8x32xf32>
    %34 = math.tanh %33 : vector<8x32xf32>
    %35 = arith.mulf %30, %34 : vector<8x32xf32>
    %36 = arith.truncf %35 : vector<8x32xf32> to vector<8x32xbf16>
    %c1_i32 = arith.constant 1 : i32
    %c8_i32_19 = arith.constant 8 : i32
    %37 = arith.muli %c1_i32, %c8_i32_19 : i32
    %38 = tpu.assume_multiple %37, 8 : i32
    %39 = arith.index_cast %38 : i32 to index
    %c0_20 = arith.constant 0 : index
    %40 = vector.load %arg11[%39, %c0_20] : memref<64x128xf32, #tpu.memory_space<vmem>>, vector<8x128xf32>
    %cst_21 = arith.constant dense<0.000000e+00> : vector<8x128xf32>
    %41 = tpu.matmul %36, %11, %cst_21 {dimension_numbers = #tpu.dot_dimension_numbers<[1], [0], [0], [1], [0, 0, 1, 1], [], []>} : vector<8x32xbf16>, vector<32x128xbf16>, vector<8x128xf32> -> vector<8x128xf32>
    %42 = arith.addf %40, %41 : vector<8x128xf32>
    %43 = vector.extract_strided_slice %42 {offsets = [0, 0], sizes = [8, 96], strides = [1, 1]} : vector<8x128xf32> to vector<8x96xf32>
    %44 = arith.negf %43 : vector<8x96xf32>
    %45 = math.exp %44 : vector<8x96xf32>
    %cst_22 = arith.constant 1.000000e+00 : f32
    %46 = vector.broadcast %cst_22 : f32 to vector<8x96xf32>
    %47 = arith.addf %46, %45 : vector<8x96xf32>
    %48 = arith.divf %46, %47 : vector<8x96xf32>
    %49 = vector.extract_strided_slice %42 {offsets = [0, 96], sizes = [8, 32], strides = [1, 1]} : vector<8x128xf32> to vector<8x32xf32>
    %50 = math.tanh %49 : vector<8x32xf32>
    %51 = vector.extract_strided_slice %48 {offsets = [0, 0], sizes = [8, 32], strides = [1, 1]} : vector<8x96xf32> to vector<8x32xf32>
    %52 = vector.extract_strided_slice %48 {offsets = [0, 32], sizes = [8, 32], strides = [1, 1]} : vector<8x96xf32> to vector<8x32xf32>
    %53 = vector.extract_strided_slice %48 {offsets = [0, 64], sizes = [8, 32], strides = [1, 1]} : vector<8x96xf32> to vector<8x32xf32>
    %54 = arith.mulf %52, %33 : vector<8x32xf32>
    %55 = arith.mulf %51, %50 : vector<8x32xf32>
    %56 = arith.addf %54, %55 : vector<8x32xf32>
    %57 = math.tanh %56 : vector<8x32xf32>
    %58 = arith.mulf %53, %57 : vector<8x32xf32>
    %59 = arith.truncf %58 : vector<8x32xf32> to vector<8x32xbf16>
    %c2_i32 = arith.constant 2 : i32
    %c8_i32_23 = arith.constant 8 : i32
    %60 = arith.muli %c2_i32, %c8_i32_23 : i32
    %61 = tpu.assume_multiple %60, 8 : i32
    %62 = arith.index_cast %61 : i32 to index
    %c0_24 = arith.constant 0 : index
    %63 = vector.load %arg11[%62, %c0_24] : memref<64x128xf32, #tpu.memory_space<vmem>>, vector<8x128xf32>
    %cst_25 = arith.constant dense<0.000000e+00> : vector<8x128xf32>
    %64 = tpu.matmul %59, %11, %cst_25 {dimension_numbers = #tpu.dot_dimension_numbers<[1], [0], [0], [1], [0, 0, 1, 1], [], []>} : vector<8x32xbf16>, vector<32x128xbf16>, vector<8x128xf32> -> vector<8x128xf32>
    %65 = arith.addf %63, %64 : vector<8x128xf32>
    %66 = vector.extract_strided_slice %65 {offsets = [0, 0], sizes = [8, 96], strides = [1, 1]} : vector<8x128xf32> to vector<8x96xf32>
    %67 = arith.negf %66 : vector<8x96xf32>
    %68 = math.exp %67 : vector<8x96xf32>
    %cst_26 = arith.constant 1.000000e+00 : f32
    %69 = vector.broadcast %cst_26 : f32 to vector<8x96xf32>
    %70 = arith.addf %69, %68 : vector<8x96xf32>
    %71 = arith.divf %69, %70 : vector<8x96xf32>
    %72 = vector.extract_strided_slice %65 {offsets = [0, 96], sizes = [8, 32], strides = [1, 1]} : vector<8x128xf32> to vector<8x32xf32>
    %73 = math.tanh %72 : vector<8x32xf32>
    %74 = vector.extract_strided_slice %71 {offsets = [0, 0], sizes = [8, 32], strides = [1, 1]} : vector<8x96xf32> to vector<8x32xf32>
    %75 = vector.extract_strided_slice %71 {offsets = [0, 32], sizes = [8, 32], strides = [1, 1]} : vector<8x96xf32> to vector<8x32xf32>
    %76 = vector.extract_strided_slice %71 {offsets = [0, 64], sizes = [8, 32], strides = [1, 1]} : vector<8x96xf32> to vector<8x32xf32>
    %77 = arith.mulf %75, %56 : vector<8x32xf32>
    %78 = arith.mulf %74, %73 : vector<8x32xf32>
    %79 = arith.addf %77, %78 : vector<8x32xf32>
    %80 = math.tanh %79 : vector<8x32xf32>
    %81 = arith.mulf %76, %80 : vector<8x32xf32>
    %82 = arith.truncf %81 : vector<8x32xf32> to vector<8x32xbf16>
    %c3_i32 = arith.constant 3 : i32
    %c8_i32_27 = arith.constant 8 : i32
    %83 = arith.muli %c3_i32, %c8_i32_27 : i32
    %84 = tpu.assume_multiple %83, 8 : i32
    %85 = arith.index_cast %84 : i32 to index
    %c0_28 = arith.constant 0 : index
    %86 = vector.load %arg11[%85, %c0_28] : memref<64x128xf32, #tpu.memory_space<vmem>>, vector<8x128xf32>
    %cst_29 = arith.constant dense<0.000000e+00> : vector<8x128xf32>
    %87 = tpu.matmul %82, %11, %cst_29 {dimension_numbers = #tpu.dot_dimension_numbers<[1], [0], [0], [1], [0, 0, 1, 1], [], []>} : vector<8x32xbf16>, vector<32x128xbf16>, vector<8x128xf32> -> vector<8x128xf32>
    %88 = arith.addf %86, %87 : vector<8x128xf32>
    %89 = vector.extract_strided_slice %88 {offsets = [0, 0], sizes = [8, 96], strides = [1, 1]} : vector<8x128xf32> to vector<8x96xf32>
    %90 = arith.negf %89 : vector<8x96xf32>
    %91 = math.exp %90 : vector<8x96xf32>
    %cst_30 = arith.constant 1.000000e+00 : f32
    %92 = vector.broadcast %cst_30 : f32 to vector<8x96xf32>
    %93 = arith.addf %92, %91 : vector<8x96xf32>
    %94 = arith.divf %92, %93 : vector<8x96xf32>
    %95 = vector.extract_strided_slice %88 {offsets = [0, 96], sizes = [8, 32], strides = [1, 1]} : vector<8x128xf32> to vector<8x32xf32>
    %96 = math.tanh %95 : vector<8x32xf32>
    %97 = vector.extract_strided_slice %94 {offsets = [0, 0], sizes = [8, 32], strides = [1, 1]} : vector<8x96xf32> to vector<8x32xf32>
    %98 = vector.extract_strided_slice %94 {offsets = [0, 32], sizes = [8, 32], strides = [1, 1]} : vector<8x96xf32> to vector<8x32xf32>
    %99 = vector.extract_strided_slice %94 {offsets = [0, 64], sizes = [8, 32], strides = [1, 1]} : vector<8x96xf32> to vector<8x32xf32>
    %100 = arith.mulf %98, %79 : vector<8x32xf32>
    %101 = arith.mulf %97, %96 : vector<8x32xf32>
    %102 = arith.addf %100, %101 : vector<8x32xf32>
    %103 = math.tanh %102 : vector<8x32xf32>
    %104 = arith.mulf %99, %103 : vector<8x32xf32>
    %105 = arith.truncf %104 : vector<8x32xf32> to vector<8x32xbf16>
    %c4_i32 = arith.constant 4 : i32
    %c8_i32_31 = arith.constant 8 : i32
    %106 = arith.muli %c4_i32, %c8_i32_31 : i32
    %107 = tpu.assume_multiple %106, 8 : i32
    %108 = arith.index_cast %107 : i32 to index
    %c0_32 = arith.constant 0 : index
    %109 = vector.load %arg11[%108, %c0_32] : memref<64x128xf32, #tpu.memory_space<vmem>>, vector<8x128xf32>
    %cst_33 = arith.constant dense<0.000000e+00> : vector<8x128xf32>
    %110 = tpu.matmul %105, %11, %cst_33 {dimension_numbers = #tpu.dot_dimension_numbers<[1], [0], [0], [1], [0, 0, 1, 1], [], []>} : vector<8x32xbf16>, vector<32x128xbf16>, vector<8x128xf32> -> vector<8x128xf32>
    %111 = arith.addf %109, %110 : vector<8x128xf32>
    %112 = vector.extract_strided_slice %111 {offsets = [0, 0], sizes = [8, 96], strides = [1, 1]} : vector<8x128xf32> to vector<8x96xf32>
    %113 = arith.negf %112 : vector<8x96xf32>
    %114 = math.exp %113 : vector<8x96xf32>
    %cst_34 = arith.constant 1.000000e+00 : f32
    %115 = vector.broadcast %cst_34 : f32 to vector<8x96xf32>
    %116 = arith.addf %115, %114 : vector<8x96xf32>
    %117 = arith.divf %115, %116 : vector<8x96xf32>
    %118 = vector.extract_strided_slice %111 {offsets = [0, 96], sizes = [8, 32], strides = [1, 1]} : vector<8x128xf32> to vector<8x32xf32>
    %119 = math.tanh %118 : vector<8x32xf32>
    %120 = vector.extract_strided_slice %117 {offsets = [0, 0], sizes = [8, 32], strides = [1, 1]} : vector<8x96xf32> to vector<8x32xf32>
    %121 = vector.extract_strided_slice %117 {offsets = [0, 32], sizes = [8, 32], strides = [1, 1]} : vector<8x96xf32> to vector<8x32xf32>
    %122 = vector.extract_strided_slice %117 {offsets = [0, 64], sizes = [8, 32], strides = [1, 1]} : vector<8x96xf32> to vector<8x32xf32>
    %123 = arith.mulf %121, %102 : vector<8x32xf32>
    %124 = arith.mulf %120, %119 : vector<8x32xf32>
    %125 = arith.addf %123, %124 : vector<8x32xf32>
    %126 = math.tanh %125 : vector<8x32xf32>
    %127 = arith.mulf %122, %126 : vector<8x32xf32>
    %128 = arith.truncf %127 : vector<8x32xf32> to vector<8x32xbf16>
    %c5_i32 = arith.constant 5 : i32
    %c8_i32_35 = arith.constant 8 : i32
    %129 = arith.muli %c5_i32, %c8_i32_35 : i32
    %130 = tpu.assume_multiple %129, 8 : i32
    %131 = arith.index_cast %130 : i32 to index
    %c0_36 = arith.constant 0 : index
    %132 = vector.load %arg11[%131, %c0_36] : memref<64x128xf32, #tpu.memory_space<vmem>>, vector<8x128xf32>
    %cst_37 = arith.constant dense<0.000000e+00> : vector<8x128xf32>
    %133 = tpu.matmul %128, %11, %cst_37 {dimension_numbers = #tpu.dot_dimension_numbers<[1], [0], [0], [1], [0, 0, 1, 1], [], []>} : vector<8x32xbf16>, vector<32x128xbf16>, vector<8x128xf32> -> vector<8x128xf32>
    %134 = arith.addf %132, %133 : vector<8x128xf32>
    %135 = vector.extract_strided_slice %134 {offsets = [0, 0], sizes = [8, 96], strides = [1, 1]} : vector<8x128xf32> to vector<8x96xf32>
    %136 = arith.negf %135 : vector<8x96xf32>
    %137 = math.exp %136 : vector<8x96xf32>
    %cst_38 = arith.constant 1.000000e+00 : f32
    %138 = vector.broadcast %cst_38 : f32 to vector<8x96xf32>
    %139 = arith.addf %138, %137 : vector<8x96xf32>
    %140 = arith.divf %138, %139 : vector<8x96xf32>
    %141 = vector.extract_strided_slice %134 {offsets = [0, 96], sizes = [8, 32], strides = [1, 1]} : vector<8x128xf32> to vector<8x32xf32>
    %142 = math.tanh %141 : vector<8x32xf32>
    %143 = vector.extract_strided_slice %140 {offsets = [0, 0], sizes = [8, 32], strides = [1, 1]} : vector<8x96xf32> to vector<8x32xf32>
    %144 = vector.extract_strided_slice %140 {offsets = [0, 32], sizes = [8, 32], strides = [1, 1]} : vector<8x96xf32> to vector<8x32xf32>
    %145 = vector.extract_strided_slice %140 {offsets = [0, 64], sizes = [8, 32], strides = [1, 1]} : vector<8x96xf32> to vector<8x32xf32>
    %146 = arith.mulf %144, %125 : vector<8x32xf32>
    %147 = arith.mulf %143, %142 : vector<8x32xf32>
    %148 = arith.addf %146, %147 : vector<8x32xf32>
    %149 = math.tanh %148 : vector<8x32xf32>
    %150 = arith.mulf %145, %149 : vector<8x32xf32>
    %151 = arith.truncf %150 : vector<8x32xf32> to vector<8x32xbf16>
    %c6_i32 = arith.constant 6 : i32
    %c8_i32_39 = arith.constant 8 : i32
    %152 = arith.muli %c6_i32, %c8_i32_39 : i32
    %153 = tpu.assume_multiple %152, 8 : i32
    %154 = arith.index_cast %153 : i32 to index
    %c0_40 = arith.constant 0 : index
    %155 = vector.load %arg11[%154, %c0_40] : memref<64x128xf32, #tpu.memory_space<vmem>>, vector<8x128xf32>
    %cst_41 = arith.constant dense<0.000000e+00> : vector<8x128xf32>
    %156 = tpu.matmul %151, %11, %cst_41 {dimension_numbers = #tpu.dot_dimension_numbers<[1], [0], [0], [1], [0, 0, 1, 1], [], []>} : vector<8x32xbf16>, vector<32x128xbf16>, vector<8x128xf32> -> vector<8x128xf32>
    %157 = arith.addf %155, %156 : vector<8x128xf32>
    %158 = vector.extract_strided_slice %157 {offsets = [0, 0], sizes = [8, 96], strides = [1, 1]} : vector<8x128xf32> to vector<8x96xf32>
    %159 = arith.negf %158 : vector<8x96xf32>
    %160 = math.exp %159 : vector<8x96xf32>
    %cst_42 = arith.constant 1.000000e+00 : f32
    %161 = vector.broadcast %cst_42 : f32 to vector<8x96xf32>
    %162 = arith.addf %161, %160 : vector<8x96xf32>
    %163 = arith.divf %161, %162 : vector<8x96xf32>
    %164 = vector.extract_strided_slice %157 {offsets = [0, 96], sizes = [8, 32], strides = [1, 1]} : vector<8x128xf32> to vector<8x32xf32>
    %165 = math.tanh %164 : vector<8x32xf32>
    %166 = vector.extract_strided_slice %163 {offsets = [0, 0], sizes = [8, 32], strides = [1, 1]} : vector<8x96xf32> to vector<8x32xf32>
    %167 = vector.extract_strided_slice %163 {offsets = [0, 32], sizes = [8, 32], strides = [1, 1]} : vector<8x96xf32> to vector<8x32xf32>
    %168 = vector.extract_strided_slice %163 {offsets = [0, 64], sizes = [8, 32], strides = [1, 1]} : vector<8x96xf32> to vector<8x32xf32>
    %169 = arith.mulf %167, %148 : vector<8x32xf32>
    %170 = arith.mulf %166, %165 : vector<8x32xf32>
    %171 = arith.addf %169, %170 : vector<8x32xf32>
    %172 = math.tanh %171 : vector<8x32xf32>
    %173 = arith.mulf %168, %172 : vector<8x32xf32>
    %174 = arith.truncf %173 : vector<8x32xf32> to vector<8x32xbf16>
    %c7_i32 = arith.constant 7 : i32
    %c8_i32_43 = arith.constant 8 : i32
    %175 = arith.muli %c7_i32, %c8_i32_43 : i32
    %176 = tpu.assume_multiple %175, 8 : i32
    %177 = arith.index_cast %176 : i32 to index
    %c0_44 = arith.constant 0 : index
    %178 = vector.load %arg11[%177, %c0_44] : memref<64x128xf32, #tpu.memory_space<vmem>>, vector<8x128xf32>
    %cst_45 = arith.constant dense<0.000000e+00> : vector<8x128xf32>
    %179 = tpu.matmul %174, %11, %cst_45 {dimension_numbers = #tpu.dot_dimension_numbers<[1], [0], [0], [1], [0, 0, 1, 1], [], []>} : vector<8x32xbf16>, vector<32x128xbf16>, vector<8x128xf32> -> vector<8x128xf32>
    %180 = arith.addf %178, %179 : vector<8x128xf32>
    %181 = vector.extract_strided_slice %180 {offsets = [0, 0], sizes = [8, 96], strides = [1, 1]} : vector<8x128xf32> to vector<8x96xf32>
    %182 = arith.negf %181 : vector<8x96xf32>
    %183 = math.exp %182 : vector<8x96xf32>
    %cst_46 = arith.constant 1.000000e+00 : f32
    %184 = vector.broadcast %cst_46 : f32 to vector<8x96xf32>
    %185 = arith.addf %184, %183 : vector<8x96xf32>
    %186 = arith.divf %184, %185 : vector<8x96xf32>
    %187 = vector.extract_strided_slice %180 {offsets = [0, 96], sizes = [8, 32], strides = [1, 1]} : vector<8x128xf32> to vector<8x32xf32>
    %188 = math.tanh %187 : vector<8x32xf32>
    %189 = vector.extract_strided_slice %186 {offsets = [0, 0], sizes = [8, 32], strides = [1, 1]} : vector<8x96xf32> to vector<8x32xf32>
    %190 = vector.extract_strided_slice %186 {offsets = [0, 32], sizes = [8, 32], strides = [1, 1]} : vector<8x96xf32> to vector<8x32xf32>
    %191 = vector.extract_strided_slice %186 {offsets = [0, 64], sizes = [8, 32], strides = [1, 1]} : vector<8x96xf32> to vector<8x32xf32>
    %192 = arith.mulf %190, %171 : vector<8x32xf32>
    %193 = arith.mulf %189, %188 : vector<8x32xf32>
    %194 = arith.addf %192, %193 : vector<8x32xf32>
    %195 = math.tanh %194 : vector<8x32xf32>
    %196 = arith.mulf %191, %195 : vector<8x32xf32>
    %197 = arith.truncf %196 : vector<8x32xf32> to vector<8x32xbf16>
    %c8_i32_47 = arith.constant 8 : i32
    %c0_48 = arith.constant 0 : index
    %c0_49 = arith.constant 0 : index
    %198 = vector.load %arg9[%c0_48, %c0_49] : memref<8x32xbf16, #tpu.memory_space<vmem>>, vector<8x32xbf16>
    tpu.vector_store %arg9[%c0_48, %c0_49], %197 {strides = array<i32>} : memref<8x32xbf16, #tpu.memory_space<vmem>>, vector<8x32xbf16>,
    %c0_50 = arith.constant 0 : index
    %c0_51 = arith.constant 0 : index
    %199 = vector.load %arg10[%c0_50, %c0_51] : memref<8x32xf32, #tpu.memory_space<vmem>>, vector<8x32xf32>
    tpu.vector_store %arg10[%c0_50, %c0_51], %194 {strides = array<i32>} : memref<8x32xf32, #tpu.memory_space<vmem>>, vector<8x32xf32>,
    %c0_i32_52 = arith.constant 0 : i32
    %200 = arith.cmpi eq, %arg1, %c0_i32_52 : i32
    %201 = arith.extui %200 : i1 to i32
    %c0_i32_53 = arith.constant 0 : i32
    %202 = arith.cmpi ne, %201, %c0_i32_53 : i32
    scf.if %202 {
      %203 = arith.extf %197 : vector<8x32xbf16> to vector<8x32xf32>
      %c0_54 = arith.constant 0 : index
      %c0_55 = arith.constant 0 : index
      %204 = vector.load %arg6[%c0_54, %c0_55] : memref<1x32xf32, #tpu.memory_space<vmem>>, vector<1x32xf32>
      %205 = vector.broadcast %204 : vector<1x32xf32> to vector<8x32xf32>
      %206 = arith.mulf %203, %205 : vector<8x32xf32>
      %cst_56 = arith.constant dense<0.000000e+00> : vector<8xf32>
      %207 = vector.multi_reduction <add>, %206, %cst_56 [1] : vector<8x32xf32> to vector<8xf32>
      %208 = vector.shape_cast %207 : vector<8xf32> to vector<8x1xf32>
      %c0_57 = arith.constant 0 : index
      %c0_58 = arith.constant 0 : index
      %209 = vector.load %arg7[%c0_57, %c0_58] : memref<1x1xf32, #tpu.memory_space<vmem>>, vector<1x1xf32>
      %210 = vector.broadcast %209 : vector<1x1xf32> to vector<8x1xf32>
      %211 = arith.addf %208, %210 : vector<8x1xf32>
      %212 = arith.negf %211 : vector<8x1xf32>
      %213 = math.exp %212 : vector<8x1xf32>
      %cst_59 = arith.constant 1.000000e+00 : f32
      %214 = vector.broadcast %cst_59 : f32 to vector<8x1xf32>
      %215 = arith.addf %214, %213 : vector<8x1xf32>
      %216 = arith.divf %214, %215 : vector<8x1xf32>
      %c0_60 = arith.constant 0 : index
      %c0_61 = arith.constant 0 : index
      %217 = vector.load %arg8[%c0_60, %c0_61] : memref<8x1xf32, #tpu.memory_space<vmem>>, vector<8x1xf32>
      tpu.vector_store %arg8[%c0_60, %c0_61], %216 {strides = array<i32>} : memref<8x1xf32, #tpu.memory_space<vmem>>, vector<8x1xf32>,
    } else {
    }
    return
  }
  func.func @transform_0(%arg0: i32, %arg1: i32) -> (i32, i32, i32) {
    %c0_i32 = arith.constant 0 : i32
    %c0_i32_0 = arith.constant 0 : i32
    return %arg1, %arg0, %c0_i32 : i32, i32, i32
  }
  func.func @transform_1(%arg0: i32, %arg1: i32) -> (i32, i32) {
    %c0_i32 = arith.constant 0 : i32
    %c0_i32_0 = arith.constant 0 : i32
    %c0_i32_1 = arith.constant 0 : i32
    return %c0_i32, %c0_i32_0 : i32, i32
  }
  func.func @transform_2(%arg0: i32, %arg1: i32) -> (i32, i32) {
    %c0_i32 = arith.constant 0 : i32
    %c0_i32_0 = arith.constant 0 : i32
    %c0_i32_1 = arith.constant 0 : i32
    return %c0_i32, %c0_i32_0 : i32, i32
  }
  func.func @transform_3(%arg0: i32, %arg1: i32) -> (i32, i32) {
    %c0_i32 = arith.constant 0 : i32
    %c0_i32_0 = arith.constant 0 : i32
    %c0_i32_1 = arith.constant 0 : i32
    return %c0_i32, %c0_i32_0 : i32, i32
  }
  func.func @transform_4(%arg0: i32, %arg1: i32) -> (i32, i32) {
    %c0_i32 = arith.constant 0 : i32
    %c0_i32_0 = arith.constant 0 : i32
    %c0_i32_1 = arith.constant 0 : i32
    return %c0_i32, %c0_i32_0 : i32, i32
  }
  func.func @transform_5(%arg0: i32, %arg1: i32) -> (i32, i32) {
    %c0_i32 = arith.constant 0 : i32
    %c0_i32_0 = arith.constant 0 : i32
    %c0_i32_1 = arith.constant 0 : i32
    return %c0_i32, %c0_i32_0 : i32, i32
  }
  func.func @transform_6(%arg0: i32, %arg1: i32) -> (i32, i32) {
    %c0_i32 = arith.constant 0 : i32
    %c0_i32_0 = arith.constant 0 : i32
    return %arg0, %c0_i32 : i32, i32
  }
}

</mosaic_0001>

<bundles_post_ra>
// kernel: tpu_custom_call.1
= control target key start
LH: loop header
LB: loop body
LE: loop exit
PB: predicated region body
PF: predicated region fallthrough
CT: control target
= control target key end

     0   :  { %s1562_s0 = inlined_call_operand.hbm [shape: bf16[8,8,32], index: 0, kind: input, shape index: {}]   ;;  %s1563_s1 = inlined_call_operand.hbm [shape: bf16[32,128], index: 1, kind: input, shape index: {}]   ;;  %s1564_s2 = inlined_call_operand.hbm [shape: bf16[32,128], index: 2, kind: input, shape index: {}]   ;;  %s1565_s3 = inlined_call_operand.hbm [shape: f32[1,128], index: 3, kind: input, shape index: {}]   ;;  %s1566_s4 = inlined_call_operand.hbm [shape: f32[1,32], index: 4, kind: input, shape index: {}]   ;;  %s1567_s5 = inlined_call_operand.<no memory space> [shape: f32[1,1], index: 5, kind: input, shape index: {}]   ;;  %s1568_s6 = inlined_call_operand.hbm [shape: f32[8,1], index: 6, kind: output, shape index: {}]  }
   0x1   :  { %v11_v0 = vstv %s1567_s5 }
   0x2   :  { %12 = vst [vmem:[#allocation5] sm:$0x1] %v11_v0 }
   0x3   :  { %13 = vsyncpa [#allocation7], 0 }
   0x4   :  { %14 = vsyncpa [#allocation10], 0 }
   0x5   :  { %15 = vsyncpa [#allocation13], 0 }
   0x6   :  { %16 = vsyncpa [#allocation8], 0  ;;  %s1282_s23 = smov [#allocation9]   ;;  %s1283_s25 = smov [#allocation12]  }
   0x7   :  { %s34_s24 = sshll.u32 %s1282_s23, 4  ;;  %s59_s26 = sshll.u32 %s1283_s25, 4  ;;  %s35_s24 = int_to_ptr.vmem [resolvable:$true] %s34_s24  ;;  %s1333_s26 = int_to_ptr.vmem [resolvable:$true] %s59_s26 }
   0x8   :  { %s1142_s29 = scalar_lea.hbm %s1563_s1, 256 }
   0x9   :  { %p1143_p0 = scmp.ne.s32.totalorder %s1563_s1, %s1142_s29  ;;  %p1146_p1 = scmp.lt.u32.totalorder %s1142_s29, %s1563_s1 }
   0xb   :  { %p1148_p2 = pnand %p1146_p1, %p1143_p0 }
   0xd   :  { %1151 = shalt.err (!%p1148_p2)
}
   0xe   :  { %s1152_s9 = scalar_lea.vmem %s35_s24, 256  ;;  %p1157_p4 = scmp.lt.s32.totalorder %s35_s24, %s35_s24 }
   0xf   :  { %p1153_p3 = scmp.ne.s32.totalorder %s35_s24, %s1152_s9  ;;  %p1158_p5 = scmp.lt.s32.totalorder %s1152_s9, %s1152_s9 }
  0x11   :  { %p1159_p6 = por %p1158_p5, %p1157_p4 }
  0x13   :  { %p1160_p7 = pnand %p1159_p6, %p1153_p3 }
  0x15   :  { %1163 = shalt.err (!%p1160_p7)
}
  0x16   :  { %s1284_s10 = smov 64   ;;  %s1285_s11 = smov 4  }
  0x17   :  { %40 = dma.hbm_to_vmem [thread:$0]  %s1563_s1, 256, %s35_s24, [#allocation10], %s1284_s10, %s1284_s10, %s1285_s11  }
  0x18   :  { %s1164_s16 = scalar_lea.hbm %s1565_s3, 16 }
  0x19   :  { %p1165_p8 = scmp.ne.s32.totalorder %s1565_s3, %s1164_s16  ;;  %p1168_p9 = scmp.lt.u32.totalorder %s1164_s16, %s1565_s3 }
  0x1b   :  { %p1170_p10 = pnand %p1168_p9, %p1165_p8 }
  0x1d   :  { %1173 = shalt.err (!%p1170_p10)
}
  0x1e   :  { %s1174_s21 = scalar_lea.vmem %s1333_s26, 16  ;;  %s1178_s1 = scalar_lea.vmem %s1333_s26, 32 }
  0x1f   :  { %p1175_p11 = scmp.ne.s32.totalorder %s1333_s26, %s1174_s21  ;;  %p1179_p12 = scmp.lt.s32.totalorder %s1333_s26, %s1333_s26 }
  0x20   :  { %p1180_p13 = scmp.lt.s32.totalorder %s1178_s1, %s1174_s21 }
  0x22   :  { %p1181_p0 = por %p1180_p13, %p1179_p12 }
  0x24   :  { %p1182_p1 = pnand %p1181_p0, %p1175_p11 }
  0x26   :  { %1185 = shalt.err (!%p1182_p1)
}
  0x27   :  { %62 = dma.hbm_to_vmem [thread:$0]  %s1565_s3, 16, %s1333_s26, [#allocation13]  }
  0x28   :  { %s1286_s24 = smov [#allocation6]   ;;  %s1287_s27 = smov [#allocation11]  }
  0x29   :  { %s22_s25 = sshll.u32 %s1286_s24, 4  ;;  %s46_s28 = sshll.u32 %s1287_s27, 4  ;;  %s23_s25 = int_to_ptr.vmem [resolvable:$true] %s22_s25  ;;  %s1368_s28 = int_to_ptr.vmem [resolvable:$true] %s46_s28 }
  0x2a   :  { %s1186_s7 = scalar_lea.hbm %s1562_s0, 512 }
  0x2b   :  { %p1187_p2 = scmp.ne.s32.totalorder %s1562_s0, %s1186_s7  ;;  %p1190_p3 = scmp.lt.u32.totalorder %s1186_s7, %s1562_s0 }
  0x2d   :  { %p1192_p4 = pnand %p1190_p3, %p1187_p2 }
  0x2f   :  { %1195 = shalt.err (!%p1192_p4)
}
  0x30   :  { %s1196_s3 = scalar_lea.vmem %s23_s25, 512  ;;  %p1201_p6 = scmp.lt.s32.totalorder %s23_s25, %s23_s25 }
  0x31   :  { %p1197_p5 = scmp.ne.s32.totalorder %s23_s25, %s1196_s3  ;;  %p1202_p7 = scmp.lt.s32.totalorder %s1196_s3, %s1196_s3 }
  0x33   :  { %p1203_p8 = por %p1202_p7, %p1201_p6 }
  0x35   :  { %p1204_p9 = pnand %p1203_p8, %p1197_p5 }
  0x37   :  { %1207 = shalt.err (!%p1204_p9)
}
  0x38   :  { %28 = dma.hbm_to_vmem [thread:$0]  %s1562_s0, 512, %s23_s25, [#allocation7], %s1284_s10, %s1284_s10, %s1285_s11  }
  0x39   :  { %s1208_s16 = scalar_lea.hbm %s1564_s2, 256 }
  0x3a   :  { %p1209_p10 = scmp.ne.s32.totalorder %s1564_s2, %s1208_s16  ;;  %p1212_p11 = scmp.lt.u32.totalorder %s1208_s16, %s1564_s2 }
  0x3c   :  { %p1214_p12 = pnand %p1212_p11, %p1209_p10 }
  0x3e   :  { %1217 = shalt.err (!%p1214_p12)
}
  0x3f   :  { %s1218_s21 = scalar_lea.vmem %s1368_s28, 256  ;;  %p1223_p0 = scmp.lt.s32.totalorder %s1368_s28, %s1368_s28 }
  0x40   :  { %p1219_p13 = scmp.ne.s32.totalorder %s1368_s28, %s1218_s21  ;;  %p1224_p1 = scmp.lt.s32.totalorder %s1218_s21, %s1218_s21 }
  0x42   :  { %p1225_p2 = por %p1224_p1, %p1223_p0 }
  0x44   :  { %p1226_p3 = pnand %p1225_p2, %p1219_p13 }
  0x46   :  { %1229 = shalt.err (!%p1226_p3)
}
  0x47   :  { %52 = dma.hbm_to_vmem [thread:$0]  %s1564_s2, 256, %s1368_s28, [#allocation10], %s1284_s10, %s1284_s10, %s1285_s11  }
  0x48   :  { %s1288_s22 = smov [#allocation14]   ;;  %s1230_s27 = scalar_lea.hbm %s1566_s4, 16 }
  0x49   :  { %s69_s23 = sshll.u32 %s1288_s22, 4  ;;  %p1231_p4 = scmp.ne.s32.totalorder %s1566_s4, %s1230_s27  ;;  %s70_s23 = int_to_ptr.vmem [resolvable:$true] %s69_s23 }
  0x4a   :  { %p1234_p5 = scmp.lt.u32.totalorder %s1230_s27, %s1566_s4 }
  0x4c   :  { %p1236_p6 = pnand %p1234_p5, %p1231_p4 }
  0x4e   :  { %1239 = shalt.err (!%p1236_p6)
}
  0x4f   :  { %s1240_s8 = scalar_lea.vmem %s70_s23, 16  ;;  %s1244_s2 = scalar_lea.vmem %s70_s23, 32 }
  0x50   :  { %p1241_p7 = scmp.ne.s32.totalorder %s70_s23, %s1240_s8  ;;  %p1245_p8 = scmp.lt.s32.totalorder %s70_s23, %s70_s23 }
  0x51   :  { %p1246_p9 = scmp.lt.s32.totalorder %s1244_s2, %s1240_s8 }
  0x53   :  { %p1247_p10 = por %p1246_p9, %p1245_p8 }
  0x55   :  { %p1248_p11 = pnand %p1247_p10, %p1241_p7 }
  0x57   :  { %1251 = shalt.err (!%p1248_p11)
}
  0x58   :  { %72 = dma.hbm_to_vmem [thread:$0]  %s1566_s4, 16, %s70_s23, [#allocation13]  }
  0x59   :  { %1274 = dma.done.wait [#allocation7], 512  }
  0x5a   :  { %1275 = vsyncadd [#allocation7], 4294966784 }
  0x5b   :  { %1276 = dma.done.wait [#allocation10], 512  }
  0x5c   :  { %1277 = vsyncadd [#allocation10], 4294966784 }
  0x5d   :  { %1278 = dma.done.wait [#allocation13], 32  }
  0x5e   :  { %1279 = vsyncadd [#allocation13], 4294967264  ;;  %vm97_vm0 = vcmask 261120   ;;  %vm95_vm1 = vcmask 257024   ;;  %v1289_v1 = vmov 0.0   ;;  %vm1290_vm2 = vmmov 0  }
  0x5f   :  { %989 = vmatprep.subr.bf16.mxu1 %v1289_v1  ;;  %98 = vst.msk [vmem:[#allocation3] sm:$0xff] %vm97_vm0, %v1289_v1  ;;  %993 = vmatprep.mubr.msk.bf16.mxu1 %vm1290_vm2, %v1289_v1  ;;  %v1291_v2 = vmov 0   ;;  %v1066_v3 = vld [vmem:[#allocation9] sm:$0xff]   ;;  %v1423_v4 = vld [vmem:[#allocation11] sm:$0xff]   ;;  %v1068_v5 = vld [vmem:[#allocation9 + $0x8] sm:$0xff]   ;;  %s1292_s4 = smov 32  }
  0x60   :  { %96 = vst.msk [vmem:[#allocation2] sm:$0xf] %vm95_vm1, %v1291_v2  ;;  %977 = vmatprep.subr.bf16.mxu0 %v1066_v3  ;;  %990 = vmatpush3.bf16.msra.mxu1 %v1423_v4  ;;  %v1426_v6 = vld [vmem:[#allocation11 + $0x8] sm:$0xff]   ;;  %v1070_v7 = vld [vmem:[#allocation6] sm:$0xff]   ;;  %v1071_v8 = vld [vmem:[#allocation6 + $0x8] sm:$0xff]   ;;  %s1293_s9 = smov 96  }
  0x61   :  { %978 = vmatpush3.bf16.msra.mxu0 %v1066_v3  ;;  %991 = vmatprep.subr.bf16.mxu1 %v1289_v1  ;;  %v1445_v10 = vld [vmem:[#allocation12] ss:$0 sm:$0xff]  ;;  %v1072_v54 = vld [vmem:[#allocation6 + $0x10] sm:$0xff]   ;;  %v1073_v55 = vld [vmem:[#allocation6 + $0x18] sm:$0xff]   ;;  %vm894_vm3 = vcmask 7168  }
  0x62   :  { %979 = vmatprep.subr.bf16.mxu0 %v1068_v5  ;;  %981 = vmatprep.mubr.msk.bf16.mxu0 %vm97_vm0, %v1070_v7 }
  0x64   :  { %992 = vmatpush3.bf16.msra.mxu1 %v1426_v6 }
  0x65   :  { %980 = vmatpush3.bf16.msra.mxu0 %v1068_v5  ;;  %997 = vmatprep.subr.bf16.mxu1 %v1289_v1 }
  0x66   :  { %1005 = vmatprep.subr.bf16.mxu0 %v1289_v1  ;;  %v241_v22 = vld [vmem:[#allocation3] sm:$0xff] }
  0x67   :  { %v240_v9 = vld [vmem:[#allocation2] sm:$0xf] }
  0x68   :  { %982 = vmatmul.mubr.msk.bf16.vlgmr.msra.gmra.mrb[0].mxu0 %vm97_vm0, %v1071_v8  ;;  %994 = vmatmul.mubr.msk.bf16.vlgmr.msra.gmra.mrb[0].mxu1 %vm97_vm0, %v240_v9 }
  0x69   :  { %998 = vmatpush3.bf16.msra.mxu1 %v1423_v4  ;;  %1001 = vmatprep.mubr.msk.bf16.mxu1 %vm1290_vm2, %v1289_v1 }
  0x6a   :  { %999 = vmatprep.subr.bf16.mxu1 %v1289_v1  ;;  %1006 = vmatpush3.bf16.msra.mxu0 %v1423_v4 }
  0x6b   :  { %1007 = vmatprep.subr.bf16.mxu0 %v1289_v1  ;;  %985 = vmatprep.mubr.msk.bf16.mxu0 %vm97_vm0, %v1072_v54 }
  0x6d   :  { %1000 = vmatpush3.bf16.msra.mxu1 %v1426_v6 }
  0x6e   :  { %1008 = vmatpush3.bf16.msra.mxu0 %v1426_v6  ;;  %1013 = vmatprep.subr.bf16.mxu1 %v1289_v1 }
  0x6f   :  { %1021 = vmatprep.subr.bf16.mxu0 %v1289_v1 }
  0x70   :  { %986 = vmatmul.mubr.msk.bf16.gmra.mrb[4].mxu0 %vm97_vm0, %v1073_v55 }
  0x71   :  { %1009 = vmatprep.mubr.msk.bf16.mxu0 %vm1290_vm2, %v1289_v1 }
 0x13b   :  { %v1447_v11 = vpop.f32.mrb[0].mxu0  ;;  %v292_v12 = vpop.f32.mrb[0].mxu1 }
 0x13c   :  { %v197_v13 = vpop.f32.mrb[1].mxu0  ;;  %v995_v14 = vpop.f32.mrb[1].mxu1  ;;  %v206_v2 = vadd.f32 %v1447_v11, %v1445_v10 }
 0x13d   :  { %v198_v15 = vadd.f32 %v1445_v10, %v197_v13  ;;  %v1450_v16 = vpop.f32.mrb[2].mxu0  ;;  %v295_v17 = vpop.f32.mrb[2].mxu1 }
 0x13e   :  { %v200_v18 = vpop.f32.mrb[3].mxu0  ;;  %v996_v19 = vpop.f32.mrb[3].mxu1 }
 0x13f   :  { %v298_v20 = vadd.f32 %v292_v12, %v198_v15  ;;  %v201_v38 = vadd.f32 %v1445_v10, %v200_v18 }
 0x141   :  { %1074 = vtanh.f32 %v298_v20  ;;  %v927_v23 = vmul.f32 -1.442695, %v298_v20 }
 0x143   :  { %1076 = vpow2.f32 %v927_v23  ;;  %v1473_v60 = vpop.f32.mrb[4].mxu0 }
 0x144   :  { %v1475_v61 = vpop.f32.mrb[5].mxu0 }
 0x145   :  { %v1477_v62 = vpop.f32.mrb[6].mxu0 }
 0x146   :  { %v1479_v63 = vpop.f32.mrb[7].mxu0 }
 0x14b   :  { %v1075_v21 = vpop.eup %1074 }
 0x14c   :  { %312 = vrot.lane.b32.xlu0 %v1075_v21, %s1292_s4 }
 0x14d   :  { %v1077_v24 = vpop.eup %1076 }
 0x14e   :  { %v302_v25 = vadd.f32 1.0, %v1077_v24 }
 0x150   :  { %307 = vrot.lane.b32.xlu0 %v241_v22, %s1292_s4  ;;  %1078 = vrcp.f32 %v302_v25 }
 0x15a   :  { %v1079_v26 = vpop.eup %1078 }
 0x1be   :  { %v313_v27 = vpop.permute.xlu0 %312 }
 0x1bf   :  { %v315_v28 = vmul.f32 %v1079_v26, %v313_v27  ;;  %v209_v27 = vadd.f32 %v1450_v16, %v1445_v10 }
 0x1c1   :  { %317 = vrot.lane.b32.xlu1 %v315_v28, %s1292_s4 }
 0x1c2   :  { %v308_v29 = vpop.permute.xlu0 %307 }
 0x1c3   :  { %v310_v30 = vmul.f32 %v1079_v26, %v308_v29 }
 0x233   :  { %v318_v31 = vpop.permute.xlu1 %317 }
 0x234   :  { %v320_v32 = vadd.f32 %v318_v31, %v310_v30 }
 0x236   :  { %1080 = vtanh.f32 %v320_v32 }
 0x240   :  { %v1081_v33 = vpop.eup %1080 }
 0x241   :  { %323 = vrot.lane.b32.xlu1 %v1081_v33, %s1292_s4 }
 0x2b3   :  { %v324_v34 = vpop.permute.xlu1 %323 }
 0x2b4   :  { %v326_v35 = vmul.f32 %v1079_v26, %v324_v34 }
 0x2b6   :  { %v327_v36 = vpack.c.bf16 %v326_v35, %v326_v35 }
 0x2b8   :  { %331 = vrot.lane.b32.xlu0 %v327_v36, %s1284_s10 }
 0x32a   :  { %v332_v37 = vpop.permute.xlu0 %331 }
 0x32b   :  { %1002 = vmatmul.mubr.msk.bf16.vlgmr.msra.gmra.mrb[4].mxu1 %vm97_vm0, %v332_v37 }
 0x32c   :  { %1014 = vmatpush3.bf16.msra.mxu1 %v1423_v4  ;;  %1017 = vmatprep.mubr.msk.bf16.mxu1 %vm1290_vm2, %v1289_v1 }
 0x32d   :  { %1015 = vmatprep.subr.bf16.mxu1 %v1289_v1 }
 0x330   :  { %1016 = vmatpush3.bf16.msra.mxu1 %v1426_v6 }
 0x331   :  { %1029 = vmatprep.subr.bf16.mxu1 %v1289_v1 }
 0x3fe   :  { %v370_v39 = vpop.f32.mrb[4].mxu1 }
 0x3ff   :  { %v376_v40 = vadd.f32 %v370_v39, %v201_v38  ;;  %v1003_v41 = vpop.f32.mrb[5].mxu1 }
 0x400   :  { %v373_v42 = vpop.f32.mrb[6].mxu1 }
 0x401   :  { %1082 = vtanh.f32 %v376_v40  ;;  %v1004_v43 = vpop.f32.mrb[7].mxu1  ;;  %v929_v45 = vmul.f32 -1.442695, %v376_v40 }
 0x403   :  { %1084 = vpow2.f32 %v929_v45 }
 0x40b   :  { %v1083_v44 = vpop.eup %1082 }
 0x40c   :  { %386 = vrot.lane.b32.xlu1 %v1083_v44, %s1292_s4 }
 0x40d   :  { %v1085_v46 = vpop.eup %1084 }
 0x40e   :  { %v380_v47 = vadd.f32 1.0, %v1085_v46 }
 0x410   :  { %1086 = vrcp.f32 %v380_v47  ;;  %v214_v47 = vadd.f32 %v1445_v10, %v1475_v61 }
 0x41a   :  { %v1087_v48 = vpop.eup %1086 }
 0x41b   :  { %v384_v51 = vmul.f32 %v1087_v48, %v320_v32 }
 0x47e   :  { %v387_v49 = vpop.permute.xlu1 %386 }
 0x47f   :  { %v389_v50 = vmul.f32 %v1087_v48, %v387_v49 }
 0x481   :  { %391 = vrot.lane.b32.xlu0 %v389_v50, %s1292_s4 }
 0x4f3   :  { %v392_v52 = vpop.permute.xlu0 %391 }
 0x4f4   :  { %v394_v53 = vadd.f32 %v392_v52, %v384_v51 }
 0x4f6   :  { %1088 = vtanh.f32 %v394_v53 }
 0x500   :  { %v1089_v56 = vpop.eup %1088 }
 0x501   :  { %397 = vrot.lane.b32.xlu1 %v1089_v56, %s1292_s4 }
 0x573   :  { %v398_v57 = vpop.permute.xlu1 %397 }
 0x574   :  { %v400_v58 = vmul.f32 %v1087_v48, %v398_v57 }
 0x576   :  { %v401_v59 = vpack.c.bf16 %v400_v58, %v400_v58 }
 0x578   :  { %405 = vrot.lane.b32.xlu0 %v401_v59, %s1284_s10 }
 0x5ea   :  { %v406_v0 = vpop.permute.xlu0 %405 }
 0x5eb   :  { %1010 = vmatmul.mubr.msk.bf16.vlgmr.msra.gmra.mrb[8].mxu0 %vm97_vm0, %v406_v0 }
 0x5ec   :  { %1022 = vmatpush3.bf16.msra.mxu0 %v1423_v4  ;;  %1025 = vmatprep.mubr.msk.bf16.mxu0 %vm1290_vm2, %v1289_v1 }
 0x5ed   :  { %1023 = vmatprep.subr.bf16.mxu0 %v1289_v1 }
 0x5f0   :  { %1024 = vmatpush3.bf16.msra.mxu0 %v1426_v6 }
 0x5f1   :  { %1037 = vmatprep.subr.bf16.mxu0 %v1289_v1 }
 0x6be   :  { %v444_v3 = vpop.f32.mrb[8].mxu0 }
 0x6bf   :  { %v450_v5 = vadd.f32 %v444_v3, %v206_v2  ;;  %v1011_v7 = vpop.f32.mrb[9].mxu0 }
 0x6c0   :  { %v447_v8 = vpop.f32.mrb[10].mxu0 }
 0x6c1   :  { %1090 = vtanh.f32 %v450_v5  ;;  %v1012_v9 = vpop.f32.mrb[11].mxu0  ;;  %v931_v13 = vmul.f32 -1.442695, %v450_v5 }
 0x6c3   :  { %1092 = vpow2.f32 %v931_v13 }
 0x6cb   :  { %v1091_v12 = vpop.eup %1090 }
 0x6cc   :  { %460 = vrot.lane.b32.xlu1 %v1091_v12, %s1292_s4  ;;  %v217_v12 = vadd.f32 %v1445_v10, %v1479_v63 }
 0x6cd   :  { %v1093_v14 = vpop.eup %1092 }
 0x6ce   :  { %v454_v15 = vadd.f32 1.0, %v1093_v14 }
 0x6d0   :  { %1094 = vrcp.f32 %v454_v15 }
 0x6da   :  { %v1095_v17 = vpop.eup %1094 }
 0x6db   :  { %v458_v11 = vmul.f32 %v1095_v17, %v394_v53 }
 0x73e   :  { %v461_v18 = vpop.permute.xlu1 %460 }
 0x73f   :  { %v463_v19 = vmul.f32 %v1095_v17, %v461_v18 }
 0x741   :  { %465 = vrot.lane.b32.xlu0 %v463_v19, %s1292_s4 }
 0x7b3   :  { %v466_v20 = vpop.permute.xlu0 %465 }
 0x7b4   :  { %v468_v21 = vadd.f32 %v466_v20, %v458_v11 }
 0x7b6   :  { %1096 = vtanh.f32 %v468_v21 }
 0x7c0   :  { %v1097_v22 = vpop.eup %1096 }
 0x7c1   :  { %471 = vrot.lane.b32.xlu1 %v1097_v22, %s1292_s4 }
 0x833   :  { %v472_v23 = vpop.permute.xlu1 %471 }
 0x834   :  { %v474_v24 = vmul.f32 %v1095_v17, %v472_v23 }
 0x836   :  { %v475_v25 = vpack.c.bf16 %v474_v24, %v474_v24 }
 0x838   :  { %479 = vrot.lane.b32.xlu0 %v475_v25, %s1284_s10 }
 0x8aa   :  { %v480_v26 = vpop.permute.xlu0 %479 }
 0x8ab   :  { %1018 = vmatmul.mubr.msk.bf16.vlgmr.msra.gmra.mrb[8].mxu1 %vm97_vm0, %v480_v26 }
 0x8ac   :  { %1030 = vmatpush3.bf16.msra.mxu1 %v1423_v4  ;;  %1033 = vmatprep.mubr.msk.bf16.mxu1 %vm1290_vm2, %v1289_v1 }
 0x8ad   :  { %1031 = vmatprep.subr.bf16.mxu1 %v1289_v1 }
 0x8b0   :  { %1032 = vmatpush3.bf16.msra.mxu1 %v1426_v6 }
 0x8b1   :  { %1045 = vmatprep.subr.bf16.mxu1 %v1289_v1 }
 0x97e   :  { %v518_v28 = vpop.f32.mrb[8].mxu1 }
 0x97f   :  { %v524_v29 = vadd.f32 %v518_v28, %v209_v27  ;;  %v1019_v30 = vpop.f32.mrb[9].mxu1 }
 0x980   :  { %v521_v31 = vpop.f32.mrb[10].mxu1 }
 0x981   :  { %1098 = vtanh.f32 %v524_v29  ;;  %v1020_v32 = vpop.f32.mrb[11].mxu1  ;;  %v933_v34 = vmul.f32 -1.442695, %v524_v29  ;;  %v222_v29 = vadd.f32 %v1473_v60, %v1445_v10 }
 0x983   :  { %1100 = vpow2.f32 %v933_v34 }
 0x98b   :  { %v1099_v33 = vpop.eup %1098 }
 0x98c   :  { %534 = vrot.lane.b32.xlu1 %v1099_v33, %s1292_s4 }
 0x98d   :  { %v1101_v35 = vpop.eup %1100 }
 0x98e   :  { %v528_v36 = vadd.f32 1.0, %v1101_v35 }
 0x990   :  { %1102 = vrcp.f32 %v528_v36 }
 0x99a   :  { %v1103_v37 = vpop.eup %1102 }
 0x99b   :  { %v532_v16 = vmul.f32 %v1103_v37, %v468_v21 }
 0x9fe   :  { %v535_v38 = vpop.permute.xlu1 %534 }
 0x9ff   :  { %v537_v39 = vmul.f32 %v1103_v37, %v535_v38 }
 0xa01   :  { %539 = vrot.lane.b32.xlu0 %v537_v39, %s1292_s4 }
 0xa73   :  { %v540_v40 = vpop.permute.xlu0 %539 }
 0xa74   :  { %v542_v41 = vadd.f32 %v540_v40, %v532_v16 }
 0xa76   :  { %1104 = vtanh.f32 %v542_v41 }
 0xa80   :  { %v1105_v42 = vpop.eup %1104 }
 0xa81   :  { %545 = vrot.lane.b32.xlu1 %v1105_v42, %s1292_s4 }
 0xaf3   :  { %v546_v43 = vpop.permute.xlu1 %545 }
 0xaf4   :  { %v548_v44 = vmul.f32 %v1103_v37, %v546_v43 }
 0xaf6   :  { %v549_v45 = vpack.c.bf16 %v548_v44, %v548_v44 }
 0xaf8   :  { %553 = vrot.lane.b32.xlu0 %v549_v45, %s1284_s10 }
 0xb6a   :  { %v554_v46 = vpop.permute.xlu0 %553 }
 0xb6b   :  { %1026 = vmatmul.mubr.msk.bf16.vlgmr.msra.gmra.mrb[12].mxu0 %vm97_vm0, %v554_v46 }
 0xb6c   :  { %1038 = vmatpush3.bf16.msra.mxu0 %v1423_v4  ;;  %1041 = vmatprep.mubr.msk.bf16.mxu0 %vm1290_vm2, %v1289_v1 }
 0xb6d   :  { %1039 = vmatprep.subr.bf16.mxu0 %v1289_v1 }
 0xb70   :  { %1040 = vmatpush3.bf16.msra.mxu0 %v1426_v6 }
 0xc3e   :  { %v592_v48 = vpop.f32.mrb[12].mxu0 }
 0xc3f   :  { %v598_v49 = vadd.f32 %v592_v48, %v214_v47  ;;  %v1027_v50 = vpop.f32.mrb[13].mxu0  ;;  %v225_v48 = vadd.f32 %v1477_v62, %v1445_v10  ;;  %v943_v10 = vld [vmem:[#allocation14] ss:$0 sm:$0xff] }
 0xc40   :  { %v595_v51 = vpop.f32.mrb[14].mxu0 }
 0xc41   :  { %1106 = vtanh.f32 %v598_v49  ;;  %v1028_v52 = vpop.f32.mrb[15].mxu0  ;;  %v935_v54 = vmul.f32 -1.442695, %v598_v49 }
 0xc43   :  { %1108 = vpow2.f32 %v935_v54 }
 0xc4b   :  { %v1107_v53 = vpop.eup %1106 }
 0xc4c   :  { %608 = vrot.lane.b32.xlu1 %v1107_v53, %s1292_s4 }
 0xc4d   :  { %v1109_v55 = vpop.eup %1108 }
 0xc4e   :  { %v602_v56 = vadd.f32 1.0, %v1109_v55 }
 0xc50   :  { %1110 = vrcp.f32 %v602_v56 }
 0xc5a   :  { %v1111_v57 = vpop.eup %1110 }
 0xc5b   :  { %v606_v61 = vmul.f32 %v1111_v57, %v542_v41 }
 0xcbe   :  { %v609_v58 = vpop.permute.xlu1 %608 }
 0xcbf   :  { %v611_v59 = vmul.f32 %v1111_v57, %v609_v58 }
 0xcc1   :  { %613 = vrot.lane.b32.xlu0 %v611_v59, %s1292_s4 }
 0xd33   :  { %v614_v0 = vpop.permute.xlu0 %613 }
 0xd34   :  { %v616_v2 = vadd.f32 %v614_v0, %v606_v61 }
 0xd36   :  { %1112 = vtanh.f32 %v616_v2 }
 0xd40   :  { %v1113_v3 = vpop.eup %1112 }
 0xd41   :  { %619 = vrot.lane.b32.xlu1 %v1113_v3, %s1292_s4 }
 0xdb3   :  { %v620_v5 = vpop.permute.xlu1 %619 }
 0xdb4   :  { %v622_v7 = vmul.f32 %v1111_v57, %v620_v5 }
 0xdb6   :  { %v623_v8 = vpack.c.bf16 %v622_v7, %v622_v7 }
 0xdb8   :  { %627 = vrot.lane.b32.xlu0 %v623_v8, %s1284_s10 }
 0xe2a   :  { %v628_v9 = vpop.permute.xlu0 %627 }
 0xe2b   :  { %1034 = vmatmul.mubr.msk.bf16.vlgmr.msra.gmra.mrb[12].mxu1 %vm97_vm0, %v628_v9 }
 0xe2c   :  { %1046 = vmatpush3.bf16.msra.mxu1 %v1423_v4  ;;  %1049 = vmatprep.mubr.msk.bf16.mxu1 %vm1290_vm2, %v1289_v1 }
 0xe2d   :  { %1047 = vmatprep.subr.bf16.mxu1 %v1289_v1 }
 0xe30   :  { %1048 = vmatpush3.bf16.msra.mxu1 %v1426_v6 }
 0xefe   :  { %v666_v13 = vpop.f32.mrb[12].mxu1 }
 0xeff   :  { %v672_v14 = vadd.f32 %v666_v13, %v217_v12  ;;  %v1035_v15 = vpop.f32.mrb[13].mxu1 }
 0xf00   :  { %v669_v17 = vpop.f32.mrb[14].mxu1 }
 0xf01   :  { %1114 = vtanh.f32 %v672_v14  ;;  %v1036_v18 = vpop.f32.mrb[15].mxu1  ;;  %v937_v4 = vmul.f32 -1.442695, %v672_v14 }
 0xf03   :  { %1116 = vpow2.f32 %v937_v4 }
 0xf0b   :  { %v1115_v19 = vpop.eup %1114 }
 0xf0c   :  { %682 = vrot.lane.b32.xlu1 %v1115_v19, %s1292_s4  ;;  %v944_v19 = vld [vmem:[#allocation5] ss:$0 sm:$0xff] }
 0xf0d   :  { %v1117_v11 = vpop.eup %1116 }
 0xf0e   :  { %v676_v20 = vadd.f32 1.0, %v1117_v11 }
 0xf10   :  { %1118 = vrcp.f32 %v676_v20 }
 0xf1a   :  { %v1119_v1 = vpop.eup %1118 }
 0xf1b   :  { %v680_v63 = vmul.f32 %v1119_v1, %v616_v2 }
 0xf7e   :  { %v683_v21 = vpop.permute.xlu1 %682 }
 0xf7f   :  { %v685_v6 = vmul.f32 %v1119_v1, %v683_v21 }
 0xf81   :  { %687 = vrot.lane.b32.xlu0 %v685_v6, %s1292_s4 }
 0xff3   :  { %v688_v22 = vpop.permute.xlu0 %687 }
 0xff4   :  { %v690_v23 = vadd.f32 %v688_v22, %v680_v63 }
 0xff6   :  { %1120 = vtanh.f32 %v690_v23 }
0x1000   :  { %v1121_v24 = vpop.eup %1120 }
0x1001   :  { %693 = vrot.lane.b32.xlu1 %v1121_v24, %s1292_s4 }
0x1073   :  { %v694_v25 = vpop.permute.xlu1 %693 }
0x1074   :  { %v696_v26 = vmul.f32 %v1119_v1, %v694_v25 }
0x1076   :  { %v697_v27 = vpack.c.bf16 %v696_v26, %v696_v26 }
0x1078   :  { %701 = vrot.lane.b32.xlu0 %v697_v27, %s1284_s10 }
0x10ea   :  { %v702_v28 = vpop.permute.xlu0 %701 }
0x10eb   :  { %1042 = vmatmul.mubr.msk.bf16.vlgmr.msra.gmra.mrb[16].mxu0 %vm97_vm0, %v702_v28 }
0x11be   :  { %v740_v30 = vpop.f32.mrb[16].mxu0 }
0x11bf   :  { %v746_v31 = vadd.f32 %v740_v30, %v222_v29  ;;  %v1043_v32 = vpop.f32.mrb[17].mxu0 }
0x11c0   :  { %v743_v33 = vpop.f32.mrb[18].mxu0 }
0x11c1   :  { %1122 = vtanh.f32 %v746_v31  ;;  %v1044_v34 = vpop.f32.mrb[19].mxu0  ;;  %v939_v36 = vmul.f32 -1.442695, %v746_v31 }
0x11c3   :  { %1124 = vpow2.f32 %v939_v36 }
0x11cb   :  { %v1123_v35 = vpop.eup %1122 }
0x11cc   :  { %756 = vrot.lane.b32.xlu1 %v1123_v35, %s1292_s4 }
0x11cd   :  { %v1125_v37 = vpop.eup %1124 }
0x11ce   :  { %v750_v38 = vadd.f32 1.0, %v1125_v37 }
0x11d0   :  { %1126 = vrcp.f32 %v750_v38 }
0x11da   :  { %v1127_v39 = vpop.eup %1126 }
0x11db   :  { %v754_v60 = vmul.f32 %v1127_v39, %v690_v23 }
0x123e   :  { %v757_v16 = vpop.permute.xlu1 %756 }
0x123f   :  { %v759_v40 = vmul.f32 %v1127_v39, %v757_v16 }
0x1241   :  { %761 = vrot.lane.b32.xlu0 %v759_v40, %s1292_s4 }
0x12b3   :  { %v762_v41 = vpop.permute.xlu0 %761 }
0x12b4   :  { %v764_v42 = vadd.f32 %v762_v41, %v754_v60 }
0x12b6   :  { %1128 = vtanh.f32 %v764_v42 }
0x12c0   :  { %v1129_v43 = vpop.eup %1128 }
0x12c1   :  { %767 = vrot.lane.b32.xlu1 %v1129_v43, %s1292_s4 }
0x1333   :  { %v768_v44 = vpop.permute.xlu1 %767 }
0x1334   :  { %v770_v45 = vmul.f32 %v1127_v39, %v768_v44 }
0x1336   :  { %v771_v46 = vpack.c.bf16 %v770_v45, %v770_v45 }
0x1338   :  { %775 = vrot.lane.b32.xlu0 %v771_v46, %s1284_s10 }
0x13aa   :  { %v776_v47 = vpop.permute.xlu0 %775 }
0x13ab   :  { %1050 = vmatmul.mubr.msk.bf16.vlgmr.msra.gmra.mrb[16].mxu1 %vm97_vm0, %v776_v47 }
0x147e   :  { %v814_v49 = vpop.f32.mrb[16].mxu1 }
0x147f   :  { %v820_v50 = vadd.f32 %v814_v49, %v225_v48  ;;  %v1051_v51 = vpop.f32.mrb[17].mxu1 }
0x1480   :  { %v817_v52 = vpop.f32.mrb[18].mxu1 }
0x1481   :  { %1130 = vtanh.f32 %v820_v50  ;;  %v1052_v53 = vpop.f32.mrb[19].mxu1  ;;  %v941_v55 = vmul.f32 -1.442695, %v820_v50 }
0x1483   :  { %1132 = vpow2.f32 %v941_v55 }
0x148b   :  { %v1131_v54 = vpop.eup %1130 }
0x148c   :  { %830 = vrot.lane.b32.xlu1 %v1131_v54, %s1292_s4 }
0x148d   :  { %v1133_v56 = vpop.eup %1132 }
0x148e   :  { %v824_v57 = vadd.f32 1.0, %v1133_v56 }
0x1490   :  { %1134 = vrcp.f32 %v824_v57 }
0x149a   :  { %v1135_v58 = vpop.eup %1134 }
0x149b   :  { %v828_v62 = vmul.f32 %v1135_v58, %v764_v42 }
0x14fe   :  { %v831_v59 = vpop.permute.xlu1 %830 }
0x14ff   :  { %v833_v61 = vmul.f32 %v1135_v58, %v831_v59 }
0x1501   :  { %835 = vrot.lane.b32.xlu0 %v833_v61, %s1292_s4 }
0x1505   :  { %869 = vrot.lane.b32.xlu0 %v943_v10, %s1284_s10 }
0x1573   :  { %v836_v0 = vpop.permute.xlu0 %835 }
0x1574   :  { %v838_v2 = vadd.f32 %v836_v0, %v828_v62 }
0x1576   :  { %1136 = vtanh.f32 %v838_v2 }
0x1577   :  { %v870_v9 = vpop.permute.xlu0 %869 }
0x1580   :  { %v1137_v3 = vpop.eup %1136 }
0x1581   :  { %841 = vrot.lane.b32.xlu1 %v1137_v3, %s1292_s4 }
0x15f3   :  { %v842_v5 = vpop.permute.xlu1 %841 }
0x15f4   :  { %v844_v7 = vmul.f32 %v1135_v58, %v842_v5 }
0x15f6   :  { %v845_v8 = vpack.c.bf16 %v844_v7, %v844_v7 }
0x15f8   :  { %v862_v12 = vunpack.c.l.bf16 %v845_v8 }
0x15fa   :  { %v872_v13 = vmul.f32 %v870_v9, %v862_v12 }
0x15fc   :  { %874 = vrot.lane.b32.xlu1 %v872_v13, %s1284_s10 }
0x1600   :  { %849 = vrot.lane.b32.xlu1 %v845_v8, %s1284_s10  ;;  %s1294_s10 = smov [#allocation15]  }
0x1601   :  { %s902_s12 = sshll.u32 %s1294_s10, 4  ;;  %s903_s12 = int_to_ptr.vmem [resolvable:$true] %s902_s12 }
0x1602   :  { %s1252_s3 = scalar_lea.vmem %s903_s12, 128  ;;  %p1257_p13 = scmp.lt.s32.totalorder %s903_s12, %s903_s12 }
0x1603   :  { %p1253_p12 = scmp.ne.s32.totalorder %s903_s12, %s1252_s3  ;;  %p1258_p0 = scmp.lt.s32.totalorder %s1252_s3, %s1252_s3 }
0x1604   :  { %855 = vrot.lane.b32.xlu1 %v838_v2, %s1293_s9 }
0x1605   :  { %p1259_p1 = por %p1258_p0, %p1257_p13 }
0x1607   :  { %p1260_p2 = pnand %p1259_p1, %p1253_p12 }
0x166e   :  { %v875_v14 = vpop.permute.xlu1 %874 }
0x166f   :  { %v877_v15 = vsel %vm97_vm0, %v875_v14, 0.0 }
0x1670   :  { %878 = vadd.xlane.f32.xlu0 %v877_v15 }
0x1672   :  { %v850_v17 = vpop.permute.xlu1 %849 }
0x1673   :  { %853 = vst.msk [vmem:[#allocation2] sm:$0xf] %vm95_vm1, %v850_v17 }
0x1676   :  { %v856_v18 = vpop.permute.xlu1 %855 }
0x1677   :  { %858 = vst.msk [vmem:[#allocation3] sm:$0xff] %vm97_vm0, %v856_v18 }
0x16fd   :  { %v879_v4 = vpop.xlane.xlu0 %878 }
0x16fe   :  { %v887_v11 = vadd.f32 %v944_v19, %v879_v4 }
0x1700   :  { %v945_v20 = vmul.f32 -1.442695, %v887_v11 }
0x1702   :  { %1138 = vpow2.f32 %v945_v20 }
0x170c   :  { %v1139_v1 = vpop.eup %1138 }
0x170d   :  { %v891_v21 = vadd.f32 1.0, %v1139_v1 }
0x170f   :  { %1140 = vrcp.f32 %v891_v21 }
0x1719   :  { %v1141_v6 = vpop.eup %1140 }
0x171a   :  { %895 = vst.msk [vmem:[#allocation15] sm:$0xff] %vm894_vm3, %v1141_v6 }
0x171b   :  { %1263 = shalt.err (!%p1260_p2)
}
0x171c   :  { %s1264_s14 = scalar_lea.hbm %s1568_s6, 128 }
0x171d   :  { %p1265_p3 = scmp.ne.s32.totalorder %s1568_s6, %s1264_s14  ;;  %p1268_p4 = scmp.lt.u32.totalorder %s1264_s14, %s1568_s6 }
0x171f   :  { %p1270_p5 = pnand %p1268_p4, %p1265_p3 }
0x1721   :  { %1273 = shalt.err (!%p1270_p5)
}
0x1722   :  { %905 = dma.vmem_to_hbm [thread:$0]  %s903_s12, 128, %s1568_s6, [#allocation8]  }
0x1723   :  { %1280 = dma.done.wait [#allocation8], 128  }
0x1724   :  { %1281 = vsyncadd [#allocation8], 4294967168 }
0x1725   :  { %909 = vsyncpa [#allocation7], 1 }
0x1726   :  { %910 = vsyncpa [#allocation10], 1 }
0x1727   :  { %911 = vsyncpa [#allocation13], 1 }
0x1728   :  { %912 = vsyncpa [#allocation8], 1 }

</bundles_post_ra>
